<compile_context>
chip_gen: v6e
topology: v6e:2x2x1
jax: 0.10.0
libtpu: 0.0.40
codegen_flags: <defaults>
</compile_context>

<pallas_src>
import numpy as np
import jax
import jax.numpy as jnp
from jax.experimental import pallas as pl
from jax.experimental.pallas import tpu as pltpu


def transition_kernel(x_ref, w_ref, bias_ref, out_ref):
    # x_ref:    (1, 4, R, Ck) bf16 -- 4 = the 2x2 pool-window members of each output pixel
    # w_ref:    (Ck, Cp)      bf16 -- 1x1 conv weight with BN scale and 0.25 pool factor folded
    # bias_ref: (1, Cp)       f32  -- 0.25 * (conv bias + BN shift); padded cols exactly 0
    # out_ref:  (1, R, Cp)    bf16 -- pooled output pixels
    r = out_ref.shape[1]
    ck = x_ref.shape[3]
    w = w_ref[...]
    bias = bias_ref[...]

    if r % 16 == 0:
        # One tall MXU matmul over all 4*R window members (amortizes the RHS push 4x),
        # bias + ReLU once on the (4R, Cp) slab, then a VPU sum of the four (R, Cp) slabs.
        x2 = x_ref[0].reshape(4 * r, ck)  # leading-dim merge: layout-free since r % 16 == 0
        y = jnp.maximum(jnp.dot(x2, w, preferred_element_type=jnp.float32) + bias, 0.0)
        acc = (y[0:r] + y[r:2 * r]) + (y[2 * r:3 * r] + y[3 * r:4 * r])
    else:
        # Tiny spatial extents (< 16 output pixels): fall back to 4 small matmuls.
        acc = None
        for p in range(4):  # static, unrolled
            y = jnp.maximum(
                jnp.dot(x_ref[0, p], w, preferred_element_type=jnp.float32) + bias, 0.0)
            acc = y if acc is None else acc + y

    out_ref[0] = acc.astype(out_ref.dtype)  # AvgPool2d(2): 0.25 already folded into w/bias


def _round_up(v, m):
    return ((v + m - 1) // m) * m


def _device_defaults():
    """(block_out_rows, vmem_limit_bytes) per TPU generation."""
    try:
        kind = jax.devices()[0].device_kind.lower()
    except Exception:
        kind = ""
    if "v7" in kind:   # 2 TCs / 64 MiB VMEM: smaller tiles, keep headroom
        return 256, 48 * 1024 * 1024
    if "v6" in kind:   # 128 MiB VMEM, fast HBM: big tiles to amortize per-step overhead
        return 1024, 96 * 1024 * 1024
    if "v5" in kind:
        return 512, 96 * 1024 * 1024
    return 512, 64 * 1024 * 1024


def _block_rows(total, target):
    """Output pixels per grid step.

    Multiple of 16 (bf16 sublane packing) whenever we tile; >= 2 grid steps whenever the
    spatial extent allows (keeps both v7x TensorCores busy at batch 1).  Partial last
    blocks are handled by Pallas masking via a pl.cdiv grid.
    """
    target = max(16, (int(target) // 16) * 16)
    if total < 16:
        return total  # single full-extent block
    two_way = ((total + 1) // 2 + 15) // 16 * 16  # ~half of total, rounded up to 16 (<= total)
    return min(target, two_way)


def transition_forward(x_nchw, conv_w, conv_b, bn_gamma, bn_beta, bn_mean, bn_var,
                       eps=1e-5, block_out_rows=None, out_dtype=jnp.bfloat16):
    """x_nchw: (N, Cin, H, W) float32. Returns (N, Cout, H//2, W//2) in `out_dtype`."""
    N, Cin, H, W = x_nchw.shape
    Cout = conv_w.shape[0]
    assert H % 2 == 0 and W % 2 == 0, "AvgPool2d(2) with odd H/W not supported"
    Ho, Wo = H // 2, W // 2
    total = Ho * Wo

    # Lane-dense padding: output channels (stores / MXU N) and input channels (MXU K).
    Cp = _round_up(Cout, 128)
    Ck = _round_up(Cin, 128)

    # Fold conv bias + BatchNorm (inference) + the 0.25 AvgPool factor into weight & bias.
    # relu(0.25 * z) == 0.25 * relu(z), so scaling before the ReLU is exact.
    s = bn_gamma / jnp.sqrt(bn_var + eps)                                  # (Cout,)
    w2 = conv_w.reshape(Cout, Cin).T.astype(jnp.float32) * (0.25 * s)[None, :]
    w = jnp.zeros((Ck, Cp), jnp.float32).at[:Cin, :Cout].set(w2).astype(jnp.bfloat16)
    bias = jnp.zeros((1, Cp), jnp.float32).at[0, :Cout].set(
        0.25 * ((conv_b - bn_mean) * s + bn_beta))

    # Single layout pass (same cost class as a plain NCHW->NHWC transpose):
    # x_arr[n, 2*dh+dw, ho*Wo+wo, c] = x_nchw[n, c, 2*ho+dh, 2*wo+dw], bf16, channels on lanes.
    x_arr = x_nchw.reshape(N, Cin, Ho, 2, Wo, 2)
    x_arr = jnp.transpose(x_arr, (0, 3, 5, 2, 4, 1)).reshape(N, 4, total, Cin)
    x_arr = x_arr.astype(jnp.bfloat16)
    if Ck != Cin:
        x_arr = jnp.pad(x_arr, ((0, 0), (0, 0), (0, 0), (0, Ck - Cin)))

    default_rows, vmem_limit = _device_defaults()
    if block_out_rows is None:
        block_out_rows = default_rows
    R = _block_rows(total, block_out_rows)
    grid = (N, pl.cdiv(total, R))

    out_pad = pl.pallas_call(
        transition_kernel,
        out_shape=jax.ShapeDtypeStruct((N, total, Cp), out_dtype),
        grid=grid,
        in_specs=[
            pl.BlockSpec((1, 4, R, Ck), lambda n, ss: (n, 0, ss, 0)),
            pl.BlockSpec((Ck, Cp), lambda n, ss: (0, 0)),
            pl.BlockSpec((1, Cp), lambda n, ss: (0, 0)),
        ],
        out_specs=pl.BlockSpec((1, R, Cp), lambda n, ss: (n, ss, 0)),
        compiler_params=pltpu.CompilerParams(
            dimension_semantics=("parallel", "parallel"),
            vmem_limit_bytes=vmem_limit,
        ),
    )(x_arr, w, bias)

    out = out_pad[:, :, :Cout].reshape(N, Ho, Wo, Cout)
    return jnp.transpose(out, (0, 3, 1, 2))  # back to NCHW


def transition_reference(x_nchw, conv_w, conv_b, bn_gamma, bn_beta, bn_mean, bn_var,
                         eps=1e-5):
    N, Cin, H, W = x_nchw.shape
    Cout = conv_w.shape[0]
    y = jnp.einsum('nchw,oc->nohw', x_nchw, conv_w.reshape(Cout, Cin))
    y = y + conv_b[None, :, None, None]
    y = (y - bn_mean[None, :, None, None]) / jnp.sqrt(bn_var + eps)[None, :, None, None]
    y = y * bn_gamma[None, :, None, None] + bn_beta[None, :, None, None]
    y = jnp.maximum(y, 0.0)
    y = y.reshape(N, Cout, H // 2, 2, W // 2, 2).mean(axis=(3, 5))
    return y


if __name__ == "__main__":
    # Small shapes consistent with the module: Transition(in_planes=8, out_planes=4)
    N, Cin, Cout, H, W = 2, 8, 4, 16, 16

    key = jax.random.PRNGKey(0)
    kx, kw, kb, kg, kbeta, km, kv = jax.random.split(key, 7)

    x = jax.random.normal(kx, (N, Cin, H, W), dtype=jnp.float32)
    # conv 1x1 parameters (PyTorch conv weight shape (Cout, Cin, 1, 1))
    conv_w = (jax.random.normal(kw, (Cout, Cin, 1, 1), dtype=jnp.float32)
              * (1.0 / np.sqrt(Cin)))
    conv_b = jax.random.normal(kb, (Cout,), dtype=jnp.float32) * 0.1
    # BatchNorm2d parameters / running stats (inference mode)
    bn_gamma = 1.0 + 0.1 * jax.random.normal(kg, (Cout,), dtype=jnp.float32)
    bn_beta = 0.1 * jax.random.normal(kbeta, (Cout,), dtype=jnp.float32)
    bn_mean = 0.1 * jax.random.normal(km, (Cout,), dtype=jnp.float32)
    bn_var = jax.random.uniform(kv, (Cout,), dtype=jnp.float32, minval=0.5, maxval=1.5)

    out = transition_forward(x, conv_w, conv_b, bn_gamma, bn_beta, bn_mean, bn_var)
    out = jax.block_until_ready(out)

    ref = transition_reference(x, conv_w, conv_b, bn_gamma, bn_beta, bn_mean, bn_var)
    assert out.shape == (N, Cout, H // 2, W // 2), out.shape
    np.testing.assert_allclose(np.asarray(out.astype(jnp.float32)), np.asarray(ref),
                               rtol=5e-2, atol=5e-2)  # bf16 operands/output

    print("KERNEL_OK")
</pallas_src>

<mosaic_0001>
module attributes {stable_mosaic.version = 11 : i64} {
  func.func @transition_kernel(%arg0: i32, %arg1: i32, %arg2: memref<1x4x32x128xbf16, #tpu.memory_space<vmem>>, %arg3: memref<128x128xbf16, #tpu.memory_space<vmem>>, %arg4: memref<1x128xf32, #tpu.memory_space<vmem>>, %arg5: memref<1x32x128xbf16, #tpu.memory_space<vmem>>) attributes {dimension_semantics = [#tpu.dimension_semantics<parallel>, #tpu.dimension_semantics<parallel>], iteration_bounds = array<i64: 2, 2>, scalar_prefetch = 0 : i64, scratch_operands = 0 : i64, tpu.core_type = #tpu.core_type<tc>, window_params = [{transform_indices = @transform_0, window_bounds = array<i64: 1, 4, 32, 128>}, {pipeline_mode = #tpu.pipeline_mode<synchronous>, transform_indices = @transform_1, window_bounds = array<i64: 128, 128>}, {pipeline_mode = #tpu.pipeline_mode<synchronous>, transform_indices = @transform_2, window_bounds = array<i64: 1, 128>}, {transform_indices = @transform_3, window_bounds = array<i64: 1, 32, 128>}]} {
    %c0 = arith.constant 0 : index
    %c0_0 = arith.constant 0 : index
    %0 = vector.load %arg3[%c0, %c0_0] : memref<128x128xbf16, #tpu.memory_space<vmem>>, vector<128x128xbf16>
    %c0_1 = arith.constant 0 : index
    %c0_2 = arith.constant 0 : index
    %1 = vector.load %arg4[%c0_1, %c0_2] : memref<1x128xf32, #tpu.memory_space<vmem>>, vector<1x128xf32>
    %c0_3 = arith.constant 0 : index
    %c0_4 = arith.constant 0 : index
    %c0_5 = arith.constant 0 : index
    %c0_6 = arith.constant 0 : index
    %2 = vector.load %arg2[%c0_3, %c0_4, %c0_5, %c0_6] : memref<1x4x32x128xbf16, #tpu.memory_space<vmem>>, vector<1x4x32x128xbf16>
    %3 = vector.shape_cast %2 : vector<1x4x32x128xbf16> to vector<4x32x128xbf16>
    %4 = vector.shape_cast %3 : vector<4x32x128xbf16> to vector<128x128xbf16>
    %cst = arith.constant dense<0.000000e+00> : vector<128x128xf32>
    %5 = tpu.matmul %4, %0, %cst {dimension_numbers = #tpu.dot_dimension_numbers<[1], [0], [0], [1], [0, 0, 1, 1], [], []>} : vector<128x128xbf16>, vector<128x128xbf16>, vector<128x128xf32> -> vector<128x128xf32>
    %6 = vector.broadcast %1 : vector<1x128xf32> to vector<128x128xf32>
    %7 = arith.addf %5, %6 : vector<128x128xf32>
    %cst_7 = arith.constant 0.000000e+00 : f32
    %8 = vector.broadcast %cst_7 : f32 to vector<128x128xf32>
    %9 = arith.maximumf %7, %8 : vector<128x128xf32>
    %10 = vector.extract_strided_slice %9 {offsets = [0, 0], sizes = [32, 128], strides = [1, 1]} : vector<128x128xf32> to vector<32x128xf32>
    %11 = vector.extract_strided_slice %9 {offsets = [32, 0], sizes = [32, 128], strides = [1, 1]} : vector<128x128xf32> to vector<32x128xf32>
    %12 = arith.addf %10, %11 : vector<32x128xf32>
    %13 = vector.extract_strided_slice %9 {offsets = [64, 0], sizes = [32, 128], strides = [1, 1]} : vector<128x128xf32> to vector<32x128xf32>
    %14 = vector.extract_strided_slice %9 {offsets = [96, 0], sizes = [32, 128], strides = [1, 1]} : vector<128x128xf32> to vector<32x128xf32>
    %15 = arith.addf %13, %14 : vector<32x128xf32>
    %16 = arith.addf %12, %15 : vector<32x128xf32>
    %17 = arith.truncf %16 : vector<32x128xf32> to vector<32x128xbf16>
    %c0_8 = arith.constant 0 : index
    %c0_9 = arith.constant 0 : index
    %c0_10 = arith.constant 0 : index
    %18 = vector.load %arg5[%c0_8, %c0_9, %c0_10] : memref<1x32x128xbf16, #tpu.memory_space<vmem>>, vector<1x32x128xbf16>
    %19 = vector.shape_cast %18 : vector<1x32x128xbf16> to vector<32x128xbf16>
    %20 = vector.shape_cast %17 : vector<32x128xbf16> to vector<1x32x128xbf16>
    tpu.vector_store %arg5[%c0_8, %c0_9, %c0_10], %20 {strides = array<i32>} : memref<1x32x128xbf16, #tpu.memory_space<vmem>>, vector<1x32x128xbf16>,
    return
  }
  func.func @transform_0(%arg0: i32, %arg1: i32) -> (i32, i32, i32, i32) {
    %c0_i32 = arith.constant 0 : i32
    %c0_i32_0 = arith.constant 0 : i32
    %c0_i32_1 = arith.constant 0 : i32
    return %arg0, %c0_i32, %arg1, %c0_i32_0 : i32, i32, i32, i32
  }
  func.func @transform_1(%arg0: i32, %arg1: i32) -> (i32, i32) {
    %c0_i32 = arith.constant 0 : i32
    %c0_i32_0 = arith.constant 0 : i32
    %c0_i32_1 = arith.constant 0 : i32
    return %c0_i32, %c0_i32_0 : i32, i32
  }
  func.func @transform_2(%arg0: i32, %arg1: i32) -> (i32, i32) {
    %c0_i32 = arith.constant 0 : i32
    %c0_i32_0 = arith.constant 0 : i32
    %c0_i32_1 = arith.constant 0 : i32
    return %c0_i32, %c0_i32_0 : i32, i32
  }
  func.func @transform_3(%arg0: i32, %arg1: i32) -> (i32, i32, i32) {
    %c0_i32 = arith.constant 0 : i32
    %c0_i32_0 = arith.constant 0 : i32
    return %arg0, %arg1, %c0_i32 : i32, i32, i32
  }
}

</mosaic_0001>

<bundles_post_ra>
// kernel: tpu_custom_call.1
= control target key start
LH: loop header
LB: loop body
LE: loop exit
PB: predicated region body
PF: predicated region fallthrough
CT: control target
= control target key end

     0   :  { %s1253_s0 = inlined_call_operand.hbm [shape: bf16[2,4,64,128], index: 0, kind: input, shape index: {}]   ;;  %s1254_s1 = inlined_call_operand.hbm [shape: bf16[128,128], index: 1, kind: input, shape index: {}]   ;;  %s1255_s2 = inlined_call_operand.vmem [shape: f32[1,128], index: 2, kind: input, shape index: {}]   ;;  %s1256_s3 = inlined_call_operand.hbm [shape: bf16[2,64,128], index: 3, kind: output, shape index: {}]  }
   0x1   :  { %1262 = sst [smem:[#allocation17_spill]] %s1254_s1 }
   0x2   :  { %8 = vsyncpa [#allocation3], 0 }
   0x3   :  { %10 = vsyncpa [#allocation3 + $0x1], 0 }
   0x4   :  { %11 = vsyncpa [#allocation6], 0 }
   0x5   :  { %12 = vsyncpa [#allocation4], 0 }
   0x6   :  { %14 = vsyncpa [#allocation4 + $0x1], 0  ;;  %s1042_s12 = smov 0   ;;  %s1044_s13 = smov 0  }
   0x7   :  { %s1046_s14 = smov 0   ;;  %s1048_s15 = smov 0  }
   0x8   :  { %s1050_s16 = smov 0   ;;  %s1052_s17 = smov 0  }
   0x9   :  { %s1054_s18 = smov 0   ;;  %s1056_s19 = smov 0  }
   0xa LB: > { %1263 = sst [smem:[#allocation14_spill]] %s1005_s18  ;;  %s646_s20 = sadd.s32 4294967295, %s1009_s19   ;;  %s1009_s19 = sphi %s1056_s19, %s20_s19   ;;  %s1005_s18 = sphi %s1054_s18, %s1278_s18   ;;  %s1001_s17 = sphi %s1052_s17, %s1283_s17   ;;  %s997_s16 = sphi %s1050_s16, %s1276_s16   ;;  %s993_s15 = sphi %s1048_s15, %s1282_s15   ;;  %s989_s14 = sphi %s1046_s14, %s1281_s14   ;;  %s985_s13 = sphi %s1044_s13, %s1280_s13   ;;  %s981_s12 = sphi %s1042_s12, %s1279_s12  }
   0xb   : > { %s647_s21 = sadd.s32 4294967294, %s1009_s19   ;;  %s29_s22 = sadd.s32 1, %s1001_s17 }
   0xc   : > { %s32_s23 = sadd.s32 1, %s1005_s18  ;;  %p30_p0 = scmp.ge.s32.totalorder %s29_s22, 2 }
   0xd   : > { %s41_s24 = sadd.s32 1, %s989_s14  ;;  %p48_p1 = scmp.ne.s32.totalorder %s989_s14, %s985_s13 }
   0xe   : > { %p49_p2 = scmp.eq.s32.totalorder %s1009_s19, 0  ;;  %s1285_s22 = smov (%p30_p0, %s29_s22), 0 }
   0xf   : > { %1264 = sst [smem:[#allocation15_spill]] %s1285_s22  ;;  %s1287_s23 = smov (!%p30_p0, %s32_s23), %s1005_s18 }
  0x10   : > { %s37_s25 = ssub.s32 %s1001_s17, %s1285_s22  ;;  %p1095_p3 = por %p49_p2, %p48_p1 }
  0x11   : > { %p34_p4 = scmp.ge.s32.totalorder %s1287_s23, 2  ;;  %p54_p5 = scmp.ne.s32.totalorder %s985_s13, %s981_s12 }
  0x12   : > { %p1101_p6 = scmp.eq.s32.totalorder %s646_s20, 0  ;;  %p122_p7 = scmp.eq.s32.totalorder %s646_s20, 3 }
  0x13   : > { %s1289_s23 = smov (%p34_p4, %s1287_s23), 0  ;;  %p128_p10 = scmp.eq.s32.totalorder %s647_s21, 3 }
  0x14   : > { %1267 = sst [smem:[#allocation16_spill]] %s1289_s23  ;;  %p1109_p8 = por %p1101_p6, %p54_p5 }
  0x15   : > { %p1113_p9 = por %p122_p7, %p48_p1  ;;  %s36_s30 = ssub.s32 %s1005_s18, %s1289_s23 }
  0x16   : > { %s1268_s28 = scalar_select %p1109_p8, 1, 0 }
  0x17   : > { %s1269_s29 = scalar_select %p1113_p9, 1, 0 }
  0x18   : > { %s38_s4 = sor.u32 %s37_s25, %s36_s30  ;;  %p648_p11 = scmp.ge.s32.totalorder %s1009_s19, 1 }
  0x19   : > { %p39_p12 = scmp.eq.s32.totalorder %s38_s4, 0  ;;  %p1120_p13 = por %p128_p10, %p54_p5 }
  0x1a   : > { %p135_p0 = scmp.lt.s32.totalorder %s1009_s19, 5  ;;  %s1011_s8 = smov [#allocation5]  }
  0x1b   : > { %s1270_s5 = scalar_select %p1120_p13, 1, 0 }
  0x1c   : > { %s1126_s6 = scalar_select %p39_p12, %s989_s14, %s41_s24  }
  0x1d   : > { %p1128_p2 = pnand %p648_p11, %p135_p0  ;;  %s147_s9 = sshll.u32 %s1011_s8, 4  ;;  %s148_s9 = int_to_ptr.vmem [resolvable:$true] %s147_s9 }
  0x1e   : > { %s894_s10 = scalar_lea.vmem %s148_s9, 1024  ;;  %p902_p9 = scmp.lt.s32.totalorder %s148_s9, %s148_s9 }
  0x1f   : > { %p782_p1 = pneg %p1128_p2  ;;  %p895_p5 = scmp.ne.s32.totalorder %s148_s9, %s894_s10 }
  0x20   : > { %p903_p12 = scmp.lt.s32.totalorder %s894_s10, %s894_s10 }
  0x21   : > { %p783_p4 = pnand %p782_p1, %p1101_p6 }
  0x22   : > { %p904_p8 = por %p903_p12, %p902_p9 }
  0x23   : > { %p885_p7 = pneg %p783_p4 }
  0x25   : > { %p897_p10 = pnand %p895_p5, %p885_p7 }
  0x27   : > { %p898_p13 = pneg %p897_p10 }
  0x29   : > { %p905_p11 = pnand %p904_p8, %p898_p13 }
  0x2b   : > { %908 = shalt.err (!%p905_p11)
}
  0x2c   : > { %s1012_s11 = smov 64   ;;  %s1013_s20 = smov 4  }
  0x2d   : > { %s1272_s1 = sld [smem:[#allocation17_spill]]  ;;  %p650_p0 = scmp.ge.s32.totalorder %s1009_s19, 4 }
  0x2f   : > { %160 = sbr.rel (%p650_p0) target bundleno = 68 (0x44), region = 24 }
  0x33   : > { %785 = dma.hbm_to_vmem [thread:$0]  (!%p783_p4), %s1272_s1, 1024, %s148_s9, [#allocation6], %s1012_s11, %s1012_s11, %s1013_s20  }
  0x34   : > { %s164_s25 = sand.u32 1, %s989_s14   ;;  %s652_s30 = sshll.u32 %s1001_s17, 2 }
  0x35   : > { %s651_s4 = sshll.u32 %s164_s25, 6  ;;  %s653_s8 = sshll.u32 %s1005_s18, 5 }
  0x36   : > { %s174_s10 = sadd.s32 %s653_s8, %s652_s30  ;;  %s168_s23 = scalar_lea.vmem [#allocation2], %s651_s4 }
  0x37   : > { %s189_s9 = sshll.u32 %s168_s23, 4  ;;  %s654_s11 = sshll.u32 %s174_s10, 6  ;;  %s190_s9 = int_to_ptr.vmem [resolvable:$true] %s189_s9 }
  0x38   : > { %s769_s20 = scalar_select %p1095_p3, [#allocation0], [#allocation10] }
  0x39   : > { %s1014_s21 = smov 512   ;;  %s1015_s1 = smov 256  }
  0x3a   : > { %770 = sst [smem:[#allocation9]] (%p1095_p3), %s1014_s21  ;;  %s1016_s22 = smov 4  }
  0x3b   : > { %s181_s24 = sld [smem:[%s769_s20]]   ;;  %s1017_s30 = smov 64  }
  0x3c   : > { %771 = sst [smem:[#allocation9 + $0x1]] (%p1095_p3), %s1015_s1  ;;  %s176_s8 = scalar_lea.hbm %s1253_s0, %s654_s11 }
  0x3d   : > { %772 = sst [smem:[#allocation9 + $0x2]] (%p1095_p3), %s1016_s22  ;;  %s165_s21 = scalar_lea.sflag [#allocation3], %s164_s25 }
  0x3e   : > { %773 = sst [smem:[#allocation9 + $0x3]] (%p1095_p3), %s1017_s30  ;;  %s1018_s18 = smov 131072  }
  0x3f   : > { %774 = sst [smem:[#allocation9 + $0x4]] (%p1095_p3), %s1017_s30 }
  0x40   : > { %775 = sst [smem:[#allocation9 + $0x5]] (%p1095_p3), %s1016_s22 }
  0x41   : > { %s655_s10 = sshll.u32 %s181_s24, 26 }
  0x42   : > { %s656_s20 = sadd.s32 134217728, %s655_s10 }
  0x43   : > { %776 = dma.general (%p1095_p3), %s176_s8, 1024, %s190_s9, %s165_s21, %s1018_s18, [#allocation9], %s656_s20, 0  }
  0x44 PF: > { %214 = sbr.rel (%p1128_p2) target bundleno = 340 (0x154), region = 32  ;;  %s1165_s1 = sand.u32 (!%p1128_p2), 1, %s985_s13  }
  0x45   : > { %s658_s11 = sshll.u32 (!%p1128_p2), %s1165_s1, 6  ;;  %s217_s30 = scalar_lea.sflag (!%p1128_p2), [#allocation3], %s1165_s1 }
  0x46   : > { %s1169_s4 = scalar_lea.vmem (!%p1128_p2), [#allocation2], %s658_s11  ;;  %p1273_p8 = scmp.ne.s32.totalorder (!%p1128_p2), %s1268_s28, 0 }
  0x49   : > { %968 = dma.done.wait (%p1273_p8), %s217_s30, 1024  }
  0x4a   : > { %970 = vsyncadd (%p1273_p8), %s217_s30, 4294966272 }
  0x4b   : > { %972 = dma.done.wait (%p1101_p6), [#allocation6], 1024  }
  0x4c   : > { %974 = vsyncadd (%p1101_p6), [#allocation6], 4294966272  ;;  %v867_v0 = vld [vmem:[#allocation5 + $0x38] sm:$0xff]   ;;  %v868_v1 = vld [vmem:[#allocation5 + $0x30] sm:$0xff]   ;;  %s660_s26 = sshll.u32 %s1165_s1, 4  ;;  %s683_s27 = sshll.u32 %s993_s15, 2 }
  0x4d   : > { %719 = vmatprep.subr.bf16.mxu0 %v867_v0  ;;  %751 = vmatprep.subr.bf16.mxu1 %v867_v0  ;;  %v869_v2 = vld [vmem:[#allocation5 + $0x28] sm:$0xff]   ;;  %v870_v3 = vld [vmem:[#allocation5 + $0x20] sm:$0xff]   ;;  %v871_v6 = vld [vmem:[#allocation5 + $0x18] sm:$0xff]   ;;  %s684_s28 = sshll.u32 %s997_s16, 3  ;;  %s246_s16 = scalar_lea.vmem [#allocation7], %s660_s26 }
  0x4e   : > { %720 = vmatpush3.bf16.msra.mxu0 %v867_v0  ;;  %759 = vmatpush3.bf16.msra.mxu1 %v867_v0  ;;  %v875_v4 = vld [vmem:[%s1169_s4] sm:$0xff]   ;;  %v872_v7 = vld [vmem:[#allocation5 + $0x10] sm:$0xff]   ;;  %v873_v8 = vld [vmem:[#allocation5 + $0x8] sm:$0xff]   ;;  %s543_s7 = sadd.s32 %s684_s28, %s683_s27  ;;  %s546_s25 = sshll.u32 %s246_s16, 4  ;;  %s1200_s25 = int_to_ptr.vmem [resolvable:$true] %s546_s25 }
  0x4f   : > { %721 = vmatprep.subr.bf16.mxu0 %v868_v1  ;;  %752 = vmatprep.subr.bf16.mxu1 %v868_v1  ;;  %v876_v5 = vld [vmem:[%s1169_s4 + $0x20] sm:$0xff]   ;;  %v877_v10 = vld [vmem:[%s1169_s4 + $0x8] sm:$0xff]   ;;  %v879_v12 = vld [vmem:[%s1169_s4 + $0x10] sm:$0xff]   ;;  %s685_s15 = sshll.u32 %s543_s7, 6  ;;  %s531_s8 = scalar_lea.sflag [#allocation4], %s1165_s1 }
  0x50   : > { %735 = vmatprep.mubr.bf16.mxu0 %v875_v4  ;;  %743 = vmatprep.mubr.bf16.mxu1 %v876_v5  ;;  %v874_v9 = vld [vmem:[#allocation5] sm:$0xff]   ;;  %v878_v11 = vld [vmem:[%s1169_s4 + $0x28] sm:$0xff]   ;;  %v880_v13 = vld [vmem:[%s1169_s4 + $0x30] sm:$0xff]   ;;  %s1198_s23 = scalar_lea.hbm %s1256_s3, %s685_s15  ;;  %s909_s10 = scalar_lea.vmem %s1200_s25, 256 }
  0x51   : > { %v881_v14 = vld [vmem:[%s1169_s4 + $0x18] sm:$0xff]   ;;  %v661_v22 = vld [vmem:[%s1255_s2] ss:$0 sm:$0xff]  ;;  %p910_p3 = scmp.ne.s32.totalorder %s1200_s25, %s909_s10  ;;  %p1274_p6 = scmp.ne.s32.totalorder %s1269_s29, 0 }
  0x52   : > { %722 = vmatpush3.bf16.msra.mxu0 %v868_v1  ;;  %760 = vmatpush3.bf16.msra.mxu1 %v868_v1  ;;  %v882_v15 = vld [vmem:[%s1169_s4 + $0x38] sm:$0xff]   ;;  %s1019_s20 = smov [#allocation7]  }
  0x53   : > { %723 = vmatprep.subr.bf16.mxu0 %v869_v2  ;;  %753 = vmatprep.subr.bf16.mxu1 %v869_v2  ;;  %p911_p9 = pnand %p910_p3, %p1274_p6  ;;  %s913_s21 = sshll.u32 %s1019_s20, 4  ;;  %s914_s21 = int_to_ptr.vmem [resolvable:$false] %s913_s21 }
  0x54   : > { %s915_s11 = scalar_lea.vmem %s914_s21, 512  ;;  %p916_p2 = scmp.lt.s32.totalorder %s1200_s25, %s914_s21 }
  0x55   : > { %p912_p13 = pneg %p911_p9  ;;  %p917_p1 = scmp.lt.s32.totalorder %s915_s11, %s909_s10 }
  0x56   : > { %724 = vmatpush3.bf16.msra.mxu0 %v869_v2  ;;  %761 = vmatpush3.bf16.msra.mxu1 %v869_v2 }
  0x57   : > { %725 = vmatprep.subr.bf16.mxu0 %v870_v3  ;;  %754 = vmatprep.subr.bf16.mxu1 %v870_v3  ;;  %p918_p4 = por %p917_p1, %p916_p2 }
  0x59   : > { %p919_p7 = pnand %p918_p4, %p912_p13 }
  0x5a   : > { %726 = vmatpush3.bf16.msra.mxu0 %v870_v3  ;;  %762 = vmatpush3.bf16.msra.mxu1 %v870_v3 }
  0x5b   : > { %727 = vmatprep.subr.bf16.mxu0 %v871_v6  ;;  %755 = vmatprep.subr.bf16.mxu1 %v871_v6 }
  0x5e   : > { %728 = vmatpush3.bf16.msra.mxu0 %v871_v6  ;;  %763 = vmatpush3.bf16.msra.mxu1 %v871_v6 }
  0x5f   : > { %729 = vmatprep.subr.bf16.mxu0 %v872_v7  ;;  %756 = vmatprep.subr.bf16.mxu1 %v872_v7 }
  0x62   : > { %730 = vmatpush3.bf16.msra.mxu0 %v872_v7  ;;  %764 = vmatpush3.bf16.msra.mxu1 %v872_v7 }
  0x63   : > { %731 = vmatprep.subr.bf16.mxu0 %v873_v8  ;;  %757 = vmatprep.subr.bf16.mxu1 %v873_v8 }
  0x66   : > { %732 = vmatpush3.bf16.msra.mxu0 %v873_v8  ;;  %765 = vmatpush3.bf16.msra.mxu1 %v873_v8 }
  0x67   : > { %733 = vmatprep.subr.bf16.mxu0 %v874_v9  ;;  %758 = vmatprep.subr.bf16.mxu1 %v874_v9 }
  0x6a   : > { %734 = vmatpush3.bf16.msra.mxu0 %v874_v9  ;;  %766 = vmatpush3.bf16.msra.mxu1 %v874_v9 }
  0x6d   : > { %736 = vmatmul.mubr.bf16.vlgmr.msra.gmra.mxu0 %v877_v10  ;;  %744 = vmatmul.mubr.bf16.vlgmr.msra.gmra.mxu1 %v878_v11 }
  0x6e   : > { %739 = vmatprep.mubr.bf16.mxu0 %v879_v12  ;;  %747 = vmatprep.mubr.bf16.mxu1 %v880_v13 }
  0x75   : > { %740 = vmatmul.mubr.bf16.gmra.mxu0 %v881_v14  ;;  %748 = vmatmul.mubr.bf16.gmra.mxu1 %v882_v15 }
 0x12d   : > { %v737_v16 = vpop.f32.mrf.mxu0  ;;  %v745_v17 = vpop.f32.mrf.mxu1 }
 0x12e   : > { %v428_v25 = vadd.f32 %v737_v16, %v661_v22  ;;  %v460_v26 = vadd.f32 %v745_v17, %v661_v22 }
 0x12f   : > { %v419_v18 = vpop.f32.mrf.mxu0  ;;  %v451_v19 = vpop.f32.mrf.mxu1 }
 0x130   : > { %v420_v29 = vadd.f32 %v661_v22, %v419_v18  ;;  %v452_v32 = vadd.f32 %v661_v22, %v451_v19  ;;  %v484_v40 = vmax.f32 %v428_v25, 0.0  ;;  %v492_v41 = vmax.f32 %v460_v26, 0.0 }
 0x131   : > { %v738_v20 = vpop.f32.mrf.mxu0  ;;  %v746_v21 = vpop.f32.mrf.mxu1 }
 0x132   : > { %v431_v33 = vadd.f32 %v738_v20, %v661_v22  ;;  %v463_v36 = vadd.f32 %v746_v21, %v661_v22  ;;  %v482_v45 = vmax.f32 %v420_v29, 0.0  ;;  %v490_v49 = vmax.f32 %v452_v32, 0.0 }
 0x133   : > { %v422_v23 = vpop.f32.mrf.mxu0  ;;  %v454_v24 = vpop.f32.mrf.mxu1 }
 0x134   : > { %v423_v46 = vadd.f32 %v661_v22, %v422_v23  ;;  %v455_v47 = vadd.f32 %v661_v22, %v454_v24  ;;  %v485_v55 = vmax.f32 %v431_v33, 0.0  ;;  %v493_v56 = vmax.f32 %v463_v36, 0.0 }
 0x135   : > { %v741_v27 = vpop.f32.mrf.mxu0  ;;  %v749_v28 = vpop.f32.mrf.mxu1 }
 0x136   : > { %v444_v30 = vadd.f32 %v741_v27, %v661_v22  ;;  %v476_v31 = vadd.f32 %v749_v28, %v661_v22  ;;  %v483_v63 = vmax.f32 %v423_v46, 0.0  ;;  %v491_v0 = vmax.f32 %v455_v47, 0.0 }
 0x137   : > { %v435_v34 = vpop.f32.mrf.mxu0  ;;  %v467_v35 = vpop.f32.mrf.mxu1 }
 0x138   : > { %v488_v37 = vmax.f32 %v444_v30, 0.0  ;;  %v436_v38 = vadd.f32 %v661_v22, %v435_v34  ;;  %v468_v39 = vadd.f32 %v661_v22, %v467_v35  ;;  %v496_v42 = vmax.f32 %v476_v31, 0.0 }
 0x139   : > { %v742_v43 = vpop.f32.mrf.mxu0  ;;  %v750_v44 = vpop.f32.mrf.mxu1 }
 0x13a   : > { %v486_v48 = vmax.f32 %v436_v38, 0.0  ;;  %v494_v50 = vmax.f32 %v468_v39, 0.0  ;;  %v447_v51 = vadd.f32 %v742_v43, %v661_v22  ;;  %v479_v52 = vadd.f32 %v750_v44, %v661_v22 }
 0x13b   : > { %v438_v53 = vpop.f32.mrf.mxu0  ;;  %v470_v54 = vpop.f32.mrf.mxu1  ;;  %v500_v57 = vadd.f32 %v488_v37, %v484_v40  ;;  %v504_v59 = vadd.f32 %v496_v42, %v492_v41 }
 0x13c   : > { %v439_v58 = vadd.f32 %v661_v22, %v438_v53  ;;  %v489_v60 = vmax.f32 %v447_v51, 0.0  ;;  %v497_v61 = vmax.f32 %v479_v52, 0.0  ;;  %v471_v62 = vadd.f32 %v661_v22, %v470_v54 }
 0x13d   : > { %v498_v1 = vadd.f32 %v486_v48, %v482_v45  ;;  %v502_v3 = vadd.f32 %v494_v50, %v490_v49  ;;  %v508_v8 = vadd.f32 %v504_v59, %v500_v57 }
 0x13e   : > { %v487_v2 = vmax.f32 %v439_v58, 0.0  ;;  %v501_v4 = vadd.f32 %v489_v60, %v485_v55  ;;  %v505_v5 = vadd.f32 %v497_v61, %v493_v56  ;;  %v495_v6 = vmax.f32 %v471_v62, 0.0 }
 0x13f   : > { %v506_v11 = vadd.f32 %v502_v3, %v498_v1 }
 0x140   : > { %v499_v7 = vadd.f32 %v487_v2, %v483_v63  ;;  %v509_v9 = vadd.f32 %v505_v5, %v501_v4  ;;  %v503_v10 = vadd.f32 %v495_v6, %v491_v0 }
 0x142   : > { %v700_v12 = vpack.c.bf16 %v509_v9, %v508_v8  ;;  %v507_v13 = vadd.f32 %v503_v10, %v499_v7 }
 0x144   : > { %702 = vst [vmem:[%s246_s16 + $0x8] sm:$0xff] %v700_v12   ;;  %v695_v14 = vpack.c.bf16 %v507_v13, %v506_v11 }
 0x146   : > { %696 = vst [vmem:[%s246_s16] sm:$0xff] %v695_v14  }
 0x147   : > { %922 = shalt.err (!%p919_p7)
}
 0x148   : > { %s923_s30 = scalar_lea.hbm %s1198_s23, 256  ;;  %s927_s22 = scalar_lea.hbm %s1256_s3, 1024 }
 0x149   : > { %p924_p5 = scmp.ne.s32.totalorder %s1198_s23, %s923_s30  ;;  %p928_p11 = scmp.lt.s32.totalorder %s1198_s23, %s1256_s3 }
 0x14a   : > { %p929_p0 = scmp.lt.s32.totalorder %s927_s22, %s923_s30 }
 0x14b   : > { %p925_p10 = pnand %p924_p5, %p1274_p6 }
 0x14c   : > { %p930_p8 = por %p929_p0, %p928_p11 }
 0x14d   : > { %p926_p12 = pneg %p925_p10 }
 0x14f   : > { %p931_p3 = pnand %p930_p8, %p926_p12 }
 0x151   : > { %934 = shalt.err (!%p931_p3)
}
 0x152   : > { %s1020_s28 = smov 64   ;;  %s1021_s7 = smov 4  }
 0x153   : > { %780 = dma.vmem_to_hbm [thread:$0]  (%p1274_p6), %s1200_s25, 256, %s1198_s23, %s531_s8, %s1020_s28, %s1020_s28, %s1021_s7  }
 0x154 PF: > { %p792_p9 = scmp.ge.s32.totalorder %s1009_s19, 2  ;;  %s561_s15 = sand.u32 1, %s981_s12  }
 0x155   : > { %p1275_p13 = scmp.ne.s32.totalorder %s1270_s5, 0  ;;  %s562_s16 = scalar_lea.sflag [#allocation4], %s561_s15 }
 0x157   : > { %p787_p2 = pnand %p792_p9, %p1275_p13 }
 0x159   : > { %p788_p1 = pneg %p787_p2 }
 0x15b   : > { %976 = dma.done.wait (%p788_p1), %s562_s16, 256  }
 0x15c   : > { %978 = vsyncadd (%p788_p1), %s562_s16, 4294967040  ;;  %s20_s19 = sadd.s32 1, %s1009_s19   ;;  %s1276_s16 = sld [smem:[#allocation14_spill]] }
 0x15d   : > { %p17_p4 = scmp.ge.s32.totalorder %s20_s19, 6   ;;  %s1277_s29 = sld [smem:[#allocation15_spill]] }
 0x15e   : > { %s1278_s18 = sld [smem:[#allocation16_spill]]  ;;  %s1279_s12 = smov %s985_s13 }
 0x15f   : > { %s1280_s13 = smov %s989_s14  ;;  %s1281_s14 = smov %s1126_s6 }
 0x160   : > { %s1282_s15 = smov %s1001_s17  ;;  %19 = sbr.rel (!%p17_p4) target bundleno = 10 (0xa), region = 86 }
 0x163   : > { %s1283_s17 = smov %s1277_s29 }
 0x165   :  { %567 = vsyncpa [#allocation3], 1 }
 0x166   :  { %569 = vsyncpa [#allocation3 + $0x1], 1 }
 0x167   :  { %570 = vsyncpa [#allocation6], 1 }
 0x168   :  { %571 = vsyncpa [#allocation4], 1 }
 0x169   :  { %573 = vsyncpa [#allocation4 + $0x1], 1 }

</bundles_post_ra>
